<compile_context>
chip_gen: v5e
topology: v5e:2x2
jax: 0.10.0
libtpu: 0.0.40
codegen_flags: <defaults>
</compile_context>

<pallas_src>
import jax
import jax.numpy as jnp
from jax.experimental import pallas as pl
from jax.experimental.pallas import tpu as pltpu

_LANES = 128
_BLOCK_ROWS = 2048          # 2048 x 128 f32 = 1 MiB per block (v7x-safe, double-buffered)
_GRID_THRESHOLD = 1 << 20   # use the gridded slab path above ~1M elements


def _quad_kernel(params_ref, x_ref, o_ref):
    # params_ref lives in SMEM: [a, b, c]
    a = params_ref[0]
    b = params_ref[1]
    c = params_ref[2]
    xv = x_ref[...]
    # Horner form: a + x * (b + c * x)  -> one fewer vmul than a + b*x + c*x*x
    o_ref[...] = a + xv * (b + c * xv)


@jax.jit
def quad_model(x, params):
    """Pallas implementation of: a + b*x + c*x**2 (all float32).

    x:      float32 array, natively shaped (N, 1) (PyTorch convention)
    params: float32 array of shape (3,) holding [a, b, c] (pre-packed once)
    """
    total = x.size

    if total < _GRID_THRESHOLD or total % _LANES != 0:
        # Small / unaligned path: operate directly on x in its native layout.
        # No pad / reshape / slice around the pallas_call — one dispatch total.
        zero_idx = (0,) * x.ndim
        return pl.pallas_call(
            _quad_kernel,
            out_shape=jax.ShapeDtypeStruct(x.shape, x.dtype),
            in_specs=[
                pl.BlockSpec(memory_space=pltpu.MemorySpace.SMEM),  # [a, b, c]
                pl.BlockSpec(x.shape, lambda: zero_idx),            # full array
            ],
            out_specs=pl.BlockSpec(x.shape, lambda: zero_idx),
            # Intentionally grid-less: at this size any grid only adds
            # ~0.35 us/step on a dispatch-dominated workload.
        )(params, x)

    # Large aligned path: lane-dense (rows, 128) slab, 1-D parallel grid.
    rows = total // _LANES
    block_rows = min(rows, _BLOCK_ROWS)
    x_slab = x.reshape(rows, _LANES)  # contiguous, no pad needed (total % 128 == 0)
    out_slab = pl.pallas_call(
        _quad_kernel,
        out_shape=jax.ShapeDtypeStruct((rows, _LANES), x.dtype),
        grid=(pl.cdiv(rows, block_rows),),
        in_specs=[
            pl.BlockSpec(memory_space=pltpu.MemorySpace.SMEM),       # [a, b, c]
            pl.BlockSpec((block_rows, _LANES), lambda i: (i, 0)),
        ],
        out_specs=pl.BlockSpec((block_rows, _LANES), lambda i: (i, 0)),
        compiler_params=pltpu.CompilerParams(
            dimension_semantics=("parallel",)),  # shards rows across v7x's 2 TCs
    )(params, x_slab)
    return out_slab.reshape(x.shape)


if __name__ == "__main__":
    key = jax.random.PRNGKey(0)
    kx, ka, kb, kc = jax.random.split(key, 4)

    # Input mirrors the script: x = np.random.rand(400, 1)
    x = jax.random.uniform(kx, (400, 1), dtype=jnp.float32)

    # Parameters mirror nn.Parameter(torch.randn(1)) — standard normal scalars.
    a = jax.random.normal(ka, (1,), dtype=jnp.float32)
    b = jax.random.normal(kb, (1,), dtype=jnp.float32)
    c = jax.random.normal(kc, (1,), dtype=jnp.float32)

    # Pack [a, b, c] ONCE outside the hot path (no per-call concatenate/astype).
    params = jnp.concatenate([a, b, c]).astype(jnp.float32)

    out = quad_model(x, params)
    jax.block_until_ready(out)

    # Reference check (plain JAX) — relative tolerance since Horner form can
    # differ by a few ULPs from the naive polynomial.
    ref = a + b * x + c * x ** 2
    assert out.shape == x.shape
    assert jnp.allclose(out, ref, rtol=1e-5, atol=1e-6), "mismatch vs reference"

    print("KERNEL_OK")
</pallas_src>

<mosaic_0001>
module attributes {stable_mosaic.version = 11 : i64} {
  func.func @_quad_kernel(%arg0: memref<3xf32, #tpu.memory_space<smem>>, %arg1: memref<400x1xf32, #tpu.memory_space<vmem>>, %arg2: memref<400x1xf32, #tpu.memory_space<vmem>>) attributes {dimension_semantics = [], scalar_prefetch = 0 : i64, scratch_operands = 0 : i64, tpu.core_type = #tpu.core_type<tc>} {
    %c0 = arith.constant 0 : index
    %0 = memref.load %arg0[%c0] : memref<3xf32, #tpu.memory_space<smem>>
    %c1 = arith.constant 1 : index
    %1 = memref.load %arg0[%c1] : memref<3xf32, #tpu.memory_space<smem>>
    %c2 = arith.constant 2 : index
    %2 = memref.load %arg0[%c2] : memref<3xf32, #tpu.memory_space<smem>>
    %c0_0 = arith.constant 0 : index
    %c0_1 = arith.constant 0 : index
    %3 = vector.load %arg1[%c0_0, %c0_1] : memref<400x1xf32, #tpu.memory_space<vmem>>, vector<400x1xf32>
    %4 = vector.broadcast %2 : f32 to vector<400x1xf32>
    %5 = arith.mulf %4, %3 : vector<400x1xf32>
    %6 = vector.broadcast %1 : f32 to vector<400x1xf32>
    %7 = arith.addf %6, %5 : vector<400x1xf32>
    %8 = arith.mulf %3, %7 : vector<400x1xf32>
    %9 = vector.broadcast %0 : f32 to vector<400x1xf32>
    %10 = arith.addf %9, %8 : vector<400x1xf32>
    %c0_2 = arith.constant 0 : index
    %c0_3 = arith.constant 0 : index
    %11 = vector.load %arg2[%c0_2, %c0_3] : memref<400x1xf32, #tpu.memory_space<vmem>>, vector<400x1xf32>
    tpu.vector_store %arg2[%c0_2, %c0_3], %10 {strides = array<i32>} : memref<400x1xf32, #tpu.memory_space<vmem>>, vector<400x1xf32>,
    return
  }
}

</mosaic_0001>

<bundles_post_ra>
// kernel: quad_model.1
= control target key start
LH: loop header
LB: loop body
LE: loop exit
PB: predicated region body
PF: predicated region fallthrough
CT: control target
= control target key end

     0   :  { %7 = vsyncpa [#allocation3], 0  ;;  %s353_s12 = smov [#allocation2]   ;;  %s878_s0 = inlined_call_operand.vmem [shape: f32[3], index: 0, kind: input, shape index: {}]   ;;  %s879_s1 = inlined_call_operand.vmem [shape: f32[400,1], index: 1, kind: input, shape index: {}]   ;;  %s880_s2 = inlined_call_operand.vmem [shape: f32[400,1], index: 2, kind: output, shape index: {}]  }
   0x1   :  { %s13_s11 = sshll.u32 %s878_s0, 4  ;;  %s14_s11 = int_to_ptr.vmem [resolvable:$true] %s13_s11 }
   0x2   :  { %16 = dma.vmem_to_smem %s14_s11, 16, %s353_s12, [#allocation3]  }
   0x3   :  { %351 = dma.done.wait [#allocation3], 16  }
   0x4   :  { %352 = vsyncadd [#allocation3], 4294967280 }
   0x5   :  { %23 = sfence }
   0x6   :  { %s24_s13 = sld [smem:[#allocation2]]  ;;  %v27_v0 = vld [vmem:[%s879_s1] sm:$0xff]  ;;  %v28_v1 = vld [vmem:[%s879_s1 + $0x8] sm:$0xff]  ;;  %v29_v2 = vld [vmem:[%s879_s1 + $0x10] sm:$0xff]  ;;  %vm280_vm0 = vcmask 7168  }
   0x7   :  { %s336_s14 = sld [smem:[#allocation2 + $0x1]]  ;;  %v30_v3 = vld [vmem:[%s879_s1 + $0x18] sm:$0xff]  ;;  %v31_v4 = vld [vmem:[%s879_s1 + $0x20] sm:$0xff]  ;;  %v32_v5 = vld [vmem:[%s879_s1 + $0x28] sm:$0xff] }
   0x8   :  { %s337_s15 = sld [smem:[#allocation2 + $0x2]]  ;;  %v33_v6 = vld [vmem:[%s879_s1 + $0x30] sm:$0xff]  ;;  %v34_v7 = vld [vmem:[%s879_s1 + $0x38] sm:$0xff]  ;;  %v35_v31 = vld [vmem:[%s879_s1 + $0x40] sm:$0xff] }
   0x9   :  { %v36_v32 = vld [vmem:[%s879_s1 + $0x48] sm:$0xff]  ;;  %v37_v37 = vld [vmem:[%s879_s1 + $0x50] sm:$0xff]  ;;  %v38_v38 = vld [vmem:[%s879_s1 + $0x58] sm:$0xff] }
   0xa   :  { %v39_v39 = vld [vmem:[%s879_s1 + $0x60] sm:$0xff]  ;;  %v40_v44 = vld [vmem:[%s879_s1 + $0x68] sm:$0xff]  ;;  %v41_v45 = vld [vmem:[%s879_s1 + $0x70] sm:$0xff] }
   0xb   :  { %v42_v46 = vld [vmem:[%s879_s1 + $0x78] sm:$0xff] }
   0xc   :  { %v400_v10 = vstv %s24_s13 }
   0xd   :  { %v398_v9 = vstv %s336_s14 }
   0xe   :  { %v396_v8 = vstv %s337_s15 }
   0xf   :  { %v78_v11 = vmul.f32 %v396_v8, %v27_v0  ;;  %v79_v12 = vmul.f32 %v396_v8, %v28_v1  ;;  %v80_v13 = vmul.f32 %v396_v8, %v29_v2  ;;  %v81_v14 = vmul.f32 %v396_v8, %v30_v3 }
  0x10   :  { %v82_v15 = vmul.f32 %v396_v8, %v31_v4  ;;  %v83_v16 = vmul.f32 %v396_v8, %v32_v5  ;;  %v84_v17 = vmul.f32 %v396_v8, %v33_v6  ;;  %v85_v18 = vmul.f32 %v396_v8, %v34_v7 }
  0x11   :  { %v129_v19 = vadd.f32 %v398_v9, %v78_v11  ;;  %v130_v20 = vadd.f32 %v398_v9, %v79_v12  ;;  %v131_v21 = vadd.f32 %v398_v9, %v80_v13  ;;  %v132_v22 = vadd.f32 %v398_v9, %v81_v14  ;;  %v44_v11 = vld [vmem:[%s879_s1 + $0x88] sm:$0xff] }
  0x12   :  { %v133_v23 = vadd.f32 %v398_v9, %v82_v15  ;;  %v134_v24 = vadd.f32 %v398_v9, %v83_v16  ;;  %v135_v25 = vadd.f32 %v398_v9, %v84_v17  ;;  %v136_v26 = vadd.f32 %v398_v9, %v85_v18  ;;  %v45_v16 = vld [vmem:[%s879_s1 + $0x90] sm:$0xff]  ;;  %v46_v17 = vld [vmem:[%s879_s1 + $0x98] sm:$0xff]  ;;  %v47_v18 = vld [vmem:[%s879_s1 + $0xa0] sm:$0xff] }
  0x13   :  { %v179_v27 = vmul.f32 %v129_v19, %v27_v0  ;;  %v180_v28 = vmul.f32 %v130_v20, %v28_v1  ;;  %v181_v29 = vmul.f32 %v131_v21, %v29_v2  ;;  %v182_v30 = vmul.f32 %v132_v22, %v30_v3 }
  0x14   :  { %v183_v33 = vmul.f32 %v133_v23, %v31_v4  ;;  %v184_v34 = vmul.f32 %v134_v24, %v32_v5  ;;  %v185_v35 = vmul.f32 %v135_v25, %v33_v6  ;;  %v186_v36 = vmul.f32 %v136_v26, %v34_v7  ;;  %v43_v7 = vld [vmem:[%s879_s1 + $0x80] sm:$0xff]  ;;  %v48_v23 = vld [vmem:[%s879_s1 + $0xa8] sm:$0xff]  ;;  %v49_v24 = vld [vmem:[%s879_s1 + $0xb0] sm:$0xff] }
  0x15   :  { %v230_v40 = vadd.f32 %v400_v10, %v179_v27  ;;  %v231_v41 = vadd.f32 %v400_v10, %v180_v28  ;;  %v232_v42 = vadd.f32 %v400_v10, %v181_v29  ;;  %v233_v43 = vadd.f32 %v400_v10, %v182_v30  ;;  %v50_v25 = vld [vmem:[%s879_s1 + $0xb8] sm:$0xff] }
  0x16   :  { %v234_v47 = vadd.f32 %v400_v10, %v183_v33  ;;  %v235_v48 = vadd.f32 %v400_v10, %v184_v34  ;;  %v236_v49 = vadd.f32 %v400_v10, %v185_v35  ;;  %v237_v50 = vadd.f32 %v400_v10, %v186_v36 }
  0x17   :  { %281 = vst.msk [vmem:[%s880_s2] sm:$0xff] %vm280_vm0, %v230_v40  ;;  %v86_v51 = vmul.f32 %v396_v8, %v35_v31  ;;  %v87_v52 = vmul.f32 %v396_v8, %v36_v32  ;;  %v88_v53 = vmul.f32 %v396_v8, %v37_v37  ;;  %v89_v54 = vmul.f32 %v396_v8, %v38_v38 }
  0x18   :  { %282 = vst.msk [vmem:[%s880_s2 + $0x8] sm:$0xff] %vm280_vm0, %v231_v41  ;;  %v90_v55 = vmul.f32 %v396_v8, %v39_v39  ;;  %v91_v56 = vmul.f32 %v396_v8, %v40_v44  ;;  %v92_v57 = vmul.f32 %v396_v8, %v41_v45  ;;  %v93_v58 = vmul.f32 %v396_v8, %v42_v46 }
  0x19   :  { %283 = vst.msk [vmem:[%s880_s2 + $0x10] sm:$0xff] %vm280_vm0, %v232_v42  ;;  %v137_v59 = vadd.f32 %v398_v9, %v86_v51  ;;  %v138_v60 = vadd.f32 %v398_v9, %v87_v52  ;;  %v139_v61 = vadd.f32 %v398_v9, %v88_v53  ;;  %v140_v62 = vadd.f32 %v398_v9, %v89_v54  ;;  %v52_v51 = vld [vmem:[%s879_s1 + $0xc8] sm:$0xff] }
  0x1a   :  { %284 = vst.msk [vmem:[%s880_s2 + $0x18] sm:$0xff] %vm280_vm0, %v233_v43  ;;  %v141_v63 = vadd.f32 %v398_v9, %v90_v55  ;;  %v142_v0 = vadd.f32 %v398_v9, %v91_v56  ;;  %v143_v1 = vadd.f32 %v398_v9, %v92_v57  ;;  %v144_v2 = vadd.f32 %v398_v9, %v93_v58  ;;  %v53_v56 = vld [vmem:[%s879_s1 + $0xd0] sm:$0xff]  ;;  %v54_v57 = vld [vmem:[%s879_s1 + $0xd8] sm:$0xff]  ;;  %v55_v58 = vld [vmem:[%s879_s1 + $0xe0] sm:$0xff] }
  0x1b   :  { %285 = vst.msk [vmem:[%s880_s2 + $0x20] sm:$0xff] %vm280_vm0, %v234_v47  ;;  %v187_v3 = vmul.f32 %v137_v59, %v35_v31  ;;  %v188_v4 = vmul.f32 %v138_v60, %v36_v32  ;;  %v189_v5 = vmul.f32 %v139_v61, %v37_v37  ;;  %v190_v6 = vmul.f32 %v140_v62, %v38_v38 }
  0x1c   :  { %286 = vst.msk [vmem:[%s880_s2 + $0x28] sm:$0xff] %vm280_vm0, %v235_v48  ;;  %v191_v12 = vmul.f32 %v141_v63, %v39_v39  ;;  %v192_v13 = vmul.f32 %v142_v0, %v40_v44  ;;  %v193_v14 = vmul.f32 %v143_v1, %v41_v45  ;;  %v194_v15 = vmul.f32 %v144_v2, %v42_v46  ;;  %v56_v63 = vld [vmem:[%s879_s1 + $0xe8] sm:$0xff]  ;;  %v57_v0 = vld [vmem:[%s879_s1 + $0xf0] sm:$0xff]  ;;  %v58_v1 = vld [vmem:[%s879_s1 + $0xf8] sm:$0xff] }
  0x1d   :  { %287 = vst.msk [vmem:[%s880_s2 + $0x30] sm:$0xff] %vm280_vm0, %v236_v49  ;;  %v238_v19 = vadd.f32 %v400_v10, %v187_v3  ;;  %v239_v20 = vadd.f32 %v400_v10, %v188_v4  ;;  %v240_v21 = vadd.f32 %v400_v10, %v189_v5  ;;  %v241_v22 = vadd.f32 %v400_v10, %v190_v6 }
  0x1e   :  { %288 = vst.msk [vmem:[%s880_s2 + $0x38] sm:$0xff] %vm280_vm0, %v237_v50  ;;  %v242_v26 = vadd.f32 %v400_v10, %v191_v12  ;;  %v243_v27 = vadd.f32 %v400_v10, %v192_v13  ;;  %v244_v28 = vadd.f32 %v400_v10, %v193_v14  ;;  %v245_v29 = vadd.f32 %v400_v10, %v194_v15  ;;  %v51_v50 = vld [vmem:[%s879_s1 + $0xc0] sm:$0xff] }
  0x1f   :  { %289 = vst.msk [vmem:[%s880_s2 + $0x40] sm:$0xff] %vm280_vm0, %v238_v19  ;;  %v94_v30 = vmul.f32 %v396_v8, %v43_v7  ;;  %v95_v31 = vmul.f32 %v396_v8, %v44_v11  ;;  %v96_v32 = vmul.f32 %v396_v8, %v45_v16  ;;  %v97_v33 = vmul.f32 %v396_v8, %v46_v17 }
  0x20   :  { %290 = vst.msk [vmem:[%s880_s2 + $0x48] sm:$0xff] %vm280_vm0, %v239_v20  ;;  %v98_v34 = vmul.f32 %v396_v8, %v47_v18  ;;  %v99_v35 = vmul.f32 %v396_v8, %v48_v23  ;;  %v100_v36 = vmul.f32 %v396_v8, %v49_v24  ;;  %v101_v37 = vmul.f32 %v396_v8, %v50_v25 }
  0x21   :  { %291 = vst.msk [vmem:[%s880_s2 + $0x50] sm:$0xff] %vm280_vm0, %v240_v21  ;;  %v145_v38 = vadd.f32 %v398_v9, %v94_v30  ;;  %v146_v39 = vadd.f32 %v398_v9, %v95_v31  ;;  %v147_v40 = vadd.f32 %v398_v9, %v96_v32  ;;  %v148_v41 = vadd.f32 %v398_v9, %v97_v33  ;;  %v60_v30 = vld [vmem:[%s879_s1 + $0x108] sm:$0xff] }
  0x22   :  { %292 = vst.msk [vmem:[%s880_s2 + $0x58] sm:$0xff] %vm280_vm0, %v241_v22  ;;  %v149_v42 = vadd.f32 %v398_v9, %v98_v34  ;;  %v150_v43 = vadd.f32 %v398_v9, %v99_v35  ;;  %v151_v44 = vadd.f32 %v398_v9, %v100_v36  ;;  %v152_v45 = vadd.f32 %v398_v9, %v101_v37  ;;  %v61_v35 = vld [vmem:[%s879_s1 + $0x110] sm:$0xff]  ;;  %v62_v36 = vld [vmem:[%s879_s1 + $0x118] sm:$0xff]  ;;  %v63_v37 = vld [vmem:[%s879_s1 + $0x120] sm:$0xff] }
  0x23   :  { %293 = vst.msk [vmem:[%s880_s2 + $0x60] sm:$0xff] %vm280_vm0, %v242_v26  ;;  %v195_v46 = vmul.f32 %v145_v38, %v43_v7  ;;  %v196_v47 = vmul.f32 %v146_v39, %v44_v11  ;;  %v197_v48 = vmul.f32 %v147_v40, %v45_v16  ;;  %v198_v49 = vmul.f32 %v148_v41, %v46_v17 }
  0x24   :  { %294 = vst.msk [vmem:[%s880_s2 + $0x68] sm:$0xff] %vm280_vm0, %v243_v27  ;;  %v199_v52 = vmul.f32 %v149_v42, %v47_v18  ;;  %v200_v53 = vmul.f32 %v150_v43, %v48_v23  ;;  %v201_v54 = vmul.f32 %v151_v44, %v49_v24  ;;  %v202_v55 = vmul.f32 %v152_v45, %v50_v25  ;;  %v64_v42 = vld [vmem:[%s879_s1 + $0x128] sm:$0xff]  ;;  %v65_v43 = vld [vmem:[%s879_s1 + $0x130] sm:$0xff]  ;;  %v66_v44 = vld [vmem:[%s879_s1 + $0x138] sm:$0xff] }
  0x25   :  { %295 = vst.msk [vmem:[%s880_s2 + $0x70] sm:$0xff] %vm280_vm0, %v244_v28  ;;  %v246_v59 = vadd.f32 %v400_v10, %v195_v46  ;;  %v247_v60 = vadd.f32 %v400_v10, %v196_v47  ;;  %v248_v61 = vadd.f32 %v400_v10, %v197_v48  ;;  %v249_v62 = vadd.f32 %v400_v10, %v198_v49 }
  0x26   :  { %296 = vst.msk [vmem:[%s880_s2 + $0x78] sm:$0xff] %vm280_vm0, %v245_v29  ;;  %v250_v2 = vadd.f32 %v400_v10, %v199_v52  ;;  %v251_v3 = vadd.f32 %v400_v10, %v200_v53  ;;  %v252_v4 = vadd.f32 %v400_v10, %v201_v54  ;;  %v253_v5 = vadd.f32 %v400_v10, %v202_v55  ;;  %v59_v29 = vld [vmem:[%s879_s1 + $0x100] sm:$0xff] }
  0x27   :  { %297 = vst.msk [vmem:[%s880_s2 + $0x80] sm:$0xff] %vm280_vm0, %v246_v59  ;;  %v102_v6 = vmul.f32 %v396_v8, %v51_v50  ;;  %v103_v7 = vmul.f32 %v396_v8, %v52_v51  ;;  %v104_v11 = vmul.f32 %v396_v8, %v53_v56  ;;  %v105_v12 = vmul.f32 %v396_v8, %v54_v57 }
  0x28   :  { %298 = vst.msk [vmem:[%s880_s2 + $0x88] sm:$0xff] %vm280_vm0, %v247_v60  ;;  %v106_v13 = vmul.f32 %v396_v8, %v55_v58  ;;  %v107_v14 = vmul.f32 %v396_v8, %v56_v63  ;;  %v108_v15 = vmul.f32 %v396_v8, %v57_v0  ;;  %v109_v16 = vmul.f32 %v396_v8, %v58_v1 }
  0x29   :  { %299 = vst.msk [vmem:[%s880_s2 + $0x90] sm:$0xff] %vm280_vm0, %v248_v61  ;;  %v153_v17 = vadd.f32 %v398_v9, %v102_v6  ;;  %v154_v18 = vadd.f32 %v398_v9, %v103_v7  ;;  %v155_v19 = vadd.f32 %v398_v9, %v104_v11  ;;  %v156_v20 = vadd.f32 %v398_v9, %v105_v12  ;;  %v68_v6 = vld [vmem:[%s879_s1 + $0x148] sm:$0xff] }
  0x2a   :  { %300 = vst.msk [vmem:[%s880_s2 + $0x98] sm:$0xff] %vm280_vm0, %v249_v62  ;;  %v157_v21 = vadd.f32 %v398_v9, %v106_v13  ;;  %v158_v22 = vadd.f32 %v398_v9, %v107_v14  ;;  %v159_v23 = vadd.f32 %v398_v9, %v108_v15  ;;  %v160_v24 = vadd.f32 %v398_v9, %v109_v16  ;;  %v69_v14 = vld [vmem:[%s879_s1 + $0x150] sm:$0xff]  ;;  %v70_v15 = vld [vmem:[%s879_s1 + $0x158] sm:$0xff]  ;;  %v71_v16 = vld [vmem:[%s879_s1 + $0x160] sm:$0xff] }
  0x2b   :  { %301 = vst.msk [vmem:[%s880_s2 + $0xa0] sm:$0xff] %vm280_vm0, %v250_v2  ;;  %v203_v25 = vmul.f32 %v153_v17, %v51_v50  ;;  %v204_v26 = vmul.f32 %v154_v18, %v52_v51  ;;  %v205_v27 = vmul.f32 %v155_v19, %v53_v56  ;;  %v206_v28 = vmul.f32 %v156_v20, %v54_v57 }
  0x2c   :  { %302 = vst.msk [vmem:[%s880_s2 + $0xa8] sm:$0xff] %vm280_vm0, %v251_v3  ;;  %v207_v31 = vmul.f32 %v157_v21, %v55_v58  ;;  %v208_v32 = vmul.f32 %v158_v22, %v56_v63  ;;  %v209_v33 = vmul.f32 %v159_v23, %v57_v0  ;;  %v210_v34 = vmul.f32 %v160_v24, %v58_v1  ;;  %v72_v21 = vld [vmem:[%s879_s1 + $0x168] sm:$0xff]  ;;  %v73_v22 = vld [vmem:[%s879_s1 + $0x170] sm:$0xff]  ;;  %v74_v23 = vld [vmem:[%s879_s1 + $0x178] sm:$0xff] }
  0x2d   :  { %303 = vst.msk [vmem:[%s880_s2 + $0xb0] sm:$0xff] %vm280_vm0, %v252_v4  ;;  %v254_v38 = vadd.f32 %v400_v10, %v203_v25  ;;  %v255_v39 = vadd.f32 %v400_v10, %v204_v26  ;;  %v256_v40 = vadd.f32 %v400_v10, %v205_v27  ;;  %v257_v41 = vadd.f32 %v400_v10, %v206_v28 }
  0x2e   :  { %304 = vst.msk [vmem:[%s880_s2 + $0xb8] sm:$0xff] %vm280_vm0, %v253_v5  ;;  %v258_v45 = vadd.f32 %v400_v10, %v207_v31  ;;  %v259_v46 = vadd.f32 %v400_v10, %v208_v32  ;;  %v260_v47 = vadd.f32 %v400_v10, %v209_v33  ;;  %v261_v48 = vadd.f32 %v400_v10, %v210_v34  ;;  %v67_v5 = vld [vmem:[%s879_s1 + $0x140] sm:$0xff] }
  0x2f   :  { %305 = vst.msk [vmem:[%s880_s2 + $0xc0] sm:$0xff] %vm280_vm0, %v254_v38  ;;  %v110_v49 = vmul.f32 %v396_v8, %v59_v29  ;;  %v111_v50 = vmul.f32 %v396_v8, %v60_v30  ;;  %v112_v51 = vmul.f32 %v396_v8, %v61_v35  ;;  %v113_v52 = vmul.f32 %v396_v8, %v62_v36 }
  0x30   :  { %306 = vst.msk [vmem:[%s880_s2 + $0xc8] sm:$0xff] %vm280_vm0, %v255_v39  ;;  %v114_v53 = vmul.f32 %v396_v8, %v63_v37  ;;  %v115_v54 = vmul.f32 %v396_v8, %v64_v42  ;;  %v116_v55 = vmul.f32 %v396_v8, %v65_v43  ;;  %v117_v56 = vmul.f32 %v396_v8, %v66_v44 }
  0x31   :  { %307 = vst.msk [vmem:[%s880_s2 + $0xd0] sm:$0xff] %vm280_vm0, %v256_v40  ;;  %v161_v57 = vadd.f32 %v398_v9, %v110_v49  ;;  %v162_v58 = vadd.f32 %v398_v9, %v111_v50  ;;  %v163_v59 = vadd.f32 %v398_v9, %v112_v51  ;;  %v164_v60 = vadd.f32 %v398_v9, %v113_v52  ;;  %v75_v50 = vld [vmem:[%s879_s1 + $0x180] sm:$0xff]  ;;  %v76_v51 = vld [vmem:[%s879_s1 + $0x188] sm:$0xff] }
  0x32   :  { %308 = vst.msk [vmem:[%s880_s2 + $0xd8] sm:$0xff] %vm280_vm0, %v257_v41  ;;  %v165_v61 = vadd.f32 %v398_v9, %v114_v53  ;;  %v166_v62 = vadd.f32 %v398_v9, %v115_v54  ;;  %v167_v63 = vadd.f32 %v398_v9, %v116_v55  ;;  %v168_v0 = vadd.f32 %v398_v9, %v117_v56 }
  0x33   :  { %309 = vst.msk [vmem:[%s880_s2 + $0xe0] sm:$0xff] %vm280_vm0, %v258_v45  ;;  %v211_v1 = vmul.f32 %v161_v57, %v59_v29  ;;  %v212_v2 = vmul.f32 %v162_v58, %v60_v30  ;;  %v213_v3 = vmul.f32 %v163_v59, %v61_v35  ;;  %v214_v4 = vmul.f32 %v164_v60, %v62_v36 }
  0x34   :  { %310 = vst.msk [vmem:[%s880_s2 + $0xe8] sm:$0xff] %vm280_vm0, %v259_v46  ;;  %v215_v7 = vmul.f32 %v165_v61, %v63_v37  ;;  %v216_v11 = vmul.f32 %v166_v62, %v64_v42  ;;  %v217_v12 = vmul.f32 %v167_v63, %v65_v43  ;;  %v218_v13 = vmul.f32 %v168_v0, %v66_v44 }
  0x35   :  { %311 = vst.msk [vmem:[%s880_s2 + $0xf0] sm:$0xff] %vm280_vm0, %v260_v47  ;;  %v262_v17 = vadd.f32 %v400_v10, %v211_v1  ;;  %v263_v18 = vadd.f32 %v400_v10, %v212_v2  ;;  %v264_v19 = vadd.f32 %v400_v10, %v213_v3  ;;  %v265_v20 = vadd.f32 %v400_v10, %v214_v4 }
  0x36   :  { %312 = vst.msk [vmem:[%s880_s2 + $0xf8] sm:$0xff] %vm280_vm0, %v261_v48  ;;  %v266_v24 = vadd.f32 %v400_v10, %v215_v7  ;;  %v267_v25 = vadd.f32 %v400_v10, %v216_v11  ;;  %v268_v26 = vadd.f32 %v400_v10, %v217_v12  ;;  %v269_v27 = vadd.f32 %v400_v10, %v218_v13 }
  0x37   :  { %313 = vst.msk [vmem:[%s880_s2 + $0x100] sm:$0xff] %vm280_vm0, %v262_v17  ;;  %v118_v28 = vmul.f32 %v396_v8, %v67_v5  ;;  %v119_v29 = vmul.f32 %v396_v8, %v68_v6  ;;  %v120_v30 = vmul.f32 %v396_v8, %v69_v14  ;;  %v121_v31 = vmul.f32 %v396_v8, %v70_v15 }
  0x38   :  { %314 = vst.msk [vmem:[%s880_s2 + $0x108] sm:$0xff] %vm280_vm0, %v263_v18  ;;  %v122_v32 = vmul.f32 %v396_v8, %v71_v16  ;;  %v123_v33 = vmul.f32 %v396_v8, %v72_v21  ;;  %v124_v34 = vmul.f32 %v396_v8, %v73_v22  ;;  %v125_v35 = vmul.f32 %v396_v8, %v74_v23 }
  0x39   :  { %315 = vst.msk [vmem:[%s880_s2 + $0x110] sm:$0xff] %vm280_vm0, %v264_v19  ;;  %v169_v36 = vadd.f32 %v398_v9, %v118_v28  ;;  %v170_v37 = vadd.f32 %v398_v9, %v119_v29  ;;  %v171_v38 = vadd.f32 %v398_v9, %v120_v30  ;;  %v172_v39 = vadd.f32 %v398_v9, %v121_v31 }
  0x3a   :  { %316 = vst.msk [vmem:[%s880_s2 + $0x118] sm:$0xff] %vm280_vm0, %v265_v20  ;;  %v173_v40 = vadd.f32 %v398_v9, %v122_v32  ;;  %v174_v41 = vadd.f32 %v398_v9, %v123_v33  ;;  %v175_v42 = vadd.f32 %v398_v9, %v124_v34  ;;  %v176_v43 = vadd.f32 %v398_v9, %v125_v35 }
  0x3b   :  { %317 = vst.msk [vmem:[%s880_s2 + $0x120] sm:$0xff] %vm280_vm0, %v266_v24  ;;  %v219_v44 = vmul.f32 %v169_v36, %v67_v5  ;;  %v220_v45 = vmul.f32 %v170_v37, %v68_v6  ;;  %v221_v46 = vmul.f32 %v171_v38, %v69_v14  ;;  %v222_v47 = vmul.f32 %v172_v39, %v70_v15 }
  0x3c   :  { %318 = vst.msk [vmem:[%s880_s2 + $0x128] sm:$0xff] %vm280_vm0, %v267_v25  ;;  %v223_v48 = vmul.f32 %v173_v40, %v71_v16  ;;  %v224_v49 = vmul.f32 %v174_v41, %v72_v21  ;;  %v225_v55 = vmul.f32 %v175_v42, %v73_v22  ;;  %v226_v57 = vmul.f32 %v176_v43, %v74_v23 }
  0x3d   :  { %319 = vst.msk [vmem:[%s880_s2 + $0x130] sm:$0xff] %vm280_vm0, %v268_v26  ;;  %v270_v52 = vadd.f32 %v400_v10, %v219_v44  ;;  %v271_v53 = vadd.f32 %v400_v10, %v220_v45  ;;  %v272_v54 = vadd.f32 %v400_v10, %v221_v46  ;;  %v273_v56 = vadd.f32 %v400_v10, %v222_v47 }
  0x3e   :  { %320 = vst.msk [vmem:[%s880_s2 + $0x138] sm:$0xff] %vm280_vm0, %v269_v27  ;;  %v274_v58 = vadd.f32 %v400_v10, %v223_v48  ;;  %v126_v59 = vmul.f32 %v396_v8, %v75_v50  ;;  %v127_v60 = vmul.f32 %v396_v8, %v76_v51  ;;  %v275_v61 = vadd.f32 %v400_v10, %v224_v49 }
  0x3f   :  { %321 = vst.msk [vmem:[%s880_s2 + $0x140] sm:$0xff] %vm280_vm0, %v270_v52  ;;  %v276_v62 = vadd.f32 %v400_v10, %v225_v55  ;;  %v277_v8 = vadd.f32 %v400_v10, %v226_v57 }
  0x40   :  { %322 = vst.msk [vmem:[%s880_s2 + $0x148] sm:$0xff] %vm280_vm0, %v271_v53  ;;  %v177_v63 = vadd.f32 %v398_v9, %v126_v59  ;;  %v178_v0 = vadd.f32 %v398_v9, %v127_v60 }
  0x41   :  { %323 = vst.msk [vmem:[%s880_s2 + $0x150] sm:$0xff] %vm280_vm0, %v272_v54 }
  0x42   :  { %324 = vst.msk [vmem:[%s880_s2 + $0x158] sm:$0xff] %vm280_vm0, %v273_v56  ;;  %v227_v1 = vmul.f32 %v177_v63, %v75_v50  ;;  %v228_v2 = vmul.f32 %v178_v0, %v76_v51 }
  0x43   :  { %325 = vst.msk [vmem:[%s880_s2 + $0x160] sm:$0xff] %vm280_vm0, %v274_v58 }
  0x44   :  { %326 = vst.msk [vmem:[%s880_s2 + $0x168] sm:$0xff] %vm280_vm0, %v275_v61  ;;  %v278_v9 = vadd.f32 %v400_v10, %v227_v1  ;;  %v279_v3 = vadd.f32 %v400_v10, %v228_v2 }
  0x45   :  { %327 = vst.msk [vmem:[%s880_s2 + $0x170] sm:$0xff] %vm280_vm0, %v276_v62 }
  0x46   :  { %328 = vst.msk [vmem:[%s880_s2 + $0x178] sm:$0xff] %vm280_vm0, %v277_v8 }
  0x47   :  { %329 = vst.msk [vmem:[%s880_s2 + $0x180] sm:$0xff] %vm280_vm0, %v278_v9 }
  0x48   :  { %330 = vst.msk [vmem:[%s880_s2 + $0x188] sm:$0xff] %vm280_vm0, %v279_v3 }
  0x49   :  { %335 = vsyncpa [#allocation3], 1 }

</bundles_post_ra>
